<compile_context>
chip_gen: v7x
topology: tpu7x:2x2x1
jax: 0.10.0
libtpu: 0.0.40
codegen_flags: <defaults>
</compile_context>

<pallas_src>
import functools

import jax
import jax.numpy as jnp
from jax import lax
from jax.experimental import pallas as pl
from jax.experimental.pallas import tpu as pltpu


def _bce_with_logits(x, y):
    # Numerically stable BCE-with-logits, matches torch.nn.BCEWithLogitsLoss
    # (reduction='none'):  max(x,0) - x*y + log(1 + exp(-|x|))
    return jnp.maximum(x, 0.0) - x * y + jnp.log1p(jnp.exp(-jnp.abs(x)))


def _yolox_loss_kernel(pred_ref, target_ref, out_ref, *,
                       num_channels, loss_type, use_l1_loss,
                       valid_count, tile_rows, blocks_per_core,
                       first_masked_block, has_padding):
    # pred_ref / target_ref: (K, tile_rows, 128) blocks in VMEM.
    # out_ref: (4, 1, 128) per-core partial-sum block, VMEM-resident across j.
    g = pl.program_id(0)          # core-parallel axis (size 2)
    j = pl.program_id(1)          # row-tile reduction axis

    @pl.when(j == 0)
    def _init():
        out_ref[...] = jnp.zeros_like(out_ref)

    def ch(ref, c):
        # Static per-channel slice (cheap view), upcast to f32 for math.
        return ref[c].astype(jnp.float32)          # (tile_rows, 128)

    px1, py1, px2, py2 = ch(pred_ref, 0), ch(pred_ref, 1), ch(pred_ref, 2), ch(pred_ref, 3)
    tx1, ty1, tx2, ty2 = ch(target_ref, 0), ch(target_ref, 1), ch(target_ref, 2), ch(target_ref, 3)

    # ---------------- IoU / GIoU per-element loss ----------------
    tl_x = jnp.maximum(px1, tx1)
    tl_y = jnp.maximum(py1, ty1)
    br_x = jnp.minimum(px2, tx2)
    br_y = jnp.minimum(py2, ty2)

    area_p = (px2 - px1) * (py2 - py1)
    area_g = (tx2 - tx1) * (ty2 - ty1)

    en = ((tl_x < br_x) & (tl_y < br_y)).astype(jnp.float32)
    area_i = (br_x - tl_x) * (br_y - tl_y) * en
    area_u = area_p + area_g - area_i
    iou = area_i / (area_u + 1e-16)

    if loss_type == 'giou':
        c_tl_x = jnp.minimum(px1, tx1)
        c_tl_y = jnp.minimum(py1, ty1)
        c_br_x = jnp.maximum(px2, tx2)
        c_br_y = jnp.maximum(py2, ty2)
        area_c = (c_br_x - c_tl_x) * (c_br_y - c_tl_y)
        giou = iou - (area_c - area_u) / jnp.maximum(area_c, 1e-16)
        iou_elems = 1.0 - jnp.clip(giou, -1.0, 1.0)
    else:
        iou_elems = 1.0 - iou * iou

    # ---------------- L1 loss on bboxes ----------------
    if use_l1_loss:
        l1_elems = (jnp.abs(px1 - tx1) + jnp.abs(py1 - ty1)
                    + jnp.abs(px2 - tx2) + jnp.abs(py2 - ty2))

    # ---------------- BCE-with-logits: conf (ch 4) ----------------
    conf_elems = _bce_with_logits(ch(pred_ref, 4), ch(target_ref, 4))

    # ---------------- BCE-with-logits: cls (ch 5..K-1), no slab ----------------
    if num_channels > 5:
        cls_elems = jnp.zeros((tile_rows, 128), jnp.float32)
        for c in range(5, num_channels):
            cls_elems = cls_elems + _bce_with_logits(ch(pred_ref, c), ch(target_ref, c))

    # ---------------- per-step reduction into the resident output block -------
    def _accum(mask):
        def add(row, plane):
            v = plane if mask is None else plane * mask
            out_ref[row] += jnp.sum(v, axis=0, keepdims=True)   # (1, 128)
        add(0, iou_elems)
        add(1, conf_elems)
        if num_channels > 5:
            add(2, cls_elems)
        if use_l1_loss:
            add(3, l1_elems)

    if not has_padding:
        _accum(None)
    else:
        lin = g * blocks_per_core + j                 # linear block index
        needs_mask = lin >= first_masked_block        # block contains padding

        @pl.when(jnp.logical_not(needs_mask))
        def _full_tile():
            _accum(None)

        @pl.when(needs_mask)
        def _partial_tile():
            row_idx = lax.broadcasted_iota(jnp.int32, (tile_rows, 128), 0)
            lane_idx = lax.broadcasted_iota(jnp.int32, (tile_rows, 128), 1)
            flat_idx = (lin * tile_rows + row_idx) * 128 + lane_idx
            _accum((flat_idx < valid_count).astype(jnp.float32))


def yolox_loss(pred, target, *, reg_weight=5.0, loss_type='giou',
               num_fg=3, use_l1_loss=True):
    """Pallas TPU implementation of YOLOXLoss.forward (reduction='none').

    pred, target: (B, N, K) with K = [x1, y1, x2, y2, conf, cls...].
    Returns (loss, reg_weight*iou_loss, conf_loss, cls_loss, l1_loss) scalars.
    """
    assert pred.shape == target.shape
    B, N, K = pred.shape
    assert K >= 5
    M = B * N
    NC = 2    # core-parallel split; harmless serial loop on 1-TC chips
    itemsize = jnp.dtype(pred.dtype).itemsize

    # Generation-aware VMEM budgeting (v5e/v6e: 128 MiB, v7x: 64 MiB).
    try:
        vmem_cap = pltpu.get_tpu_info().vmem_capacity_bytes
    except Exception:
        vmem_cap = 64 * 1024 * 1024
    if vmem_cap >= 100 * 1024 * 1024:
        budget_per_buf = 8 * 1024 * 1024
        vmem_limit = 64 * 1024 * 1024
    else:
        budget_per_buf = 4 * 1024 * 1024
        vmem_limit = 32 * 1024 * 1024

    tr = budget_per_buf // max(1, K * 128 * itemsize)
    tr = max(8, min(1024, (tr // 8) * 8))

    rows_needed = max(1, -(-M // 128))
    rows_rounded = -(-rows_needed // 8) * 8
    tile_rows = min(tr, rows_rounded)
    blocks_per_core = -(-rows_rounded // (NC * tile_rows))
    padded_rows = NC * blocks_per_core * tile_rows
    grid = (NC, blocks_per_core)

    def relayout(x):
        # Pad the anchor axis *before* the transpose so XLA emits a single
        # fused pad+transpose copy per tensor; reshapes are free.  Input dtype
        # is preserved (bf16 inputs halve DMA bytes).
        x = x.reshape(M, K)
        pad = padded_rows * 128 - M
        if pad:
            x = jnp.pad(x, ((0, pad), (0, 0)))
        return x.T.reshape(K, padded_rows, 128)

    pred_t = relayout(pred)
    target_t = relayout(target)

    kernel = functools.partial(
        _yolox_loss_kernel,
        num_channels=K,
        loss_type=loss_type,
        use_l1_loss=bool(use_l1_loss),
        valid_count=M,
        tile_rows=tile_rows,
        blocks_per_core=blocks_per_core,
        first_masked_block=M // (tile_rows * 128),
        has_padding=(padded_rows * 128 != M),
    )

    in_block = pl.BlockSpec(
        (K, tile_rows, 128),
        lambda g, j: (0, g * blocks_per_core + j, 0))
    # TODO(synk): for very large K on v7x, pipeline_mode=pl.Buffered(3) on the
    # input specs may hide DMA issue latency of the smaller forced tiles.

    out = pl.pallas_call(
        kernel,
        out_shape=jax.ShapeDtypeStruct((NC * 4, 1, 128), jnp.float32),
        grid_spec=pltpu.PrefetchScalarGridSpec(
            num_scalar_prefetch=0,
            grid=grid,
            in_specs=[in_block, in_block],
            out_specs=pl.BlockSpec((4, 1, 128), lambda g, j: (g, 0, 0)),
        ),
        compiler_params=pltpu.CompilerParams(
            dimension_semantics=("parallel", "arbitrary"),
            vmem_limit_bytes=vmem_limit,
        ),
    )(pred_t, target_t)

    # Combine per-core raw sums outside the kernel; num_fg / reg_weight stay as
    # (possibly traced) wrapper-side scalars -> no kernel recompiles.
    sums = jnp.sum(out.reshape(NC, 4, 128), axis=(0, 2))
    num_fg_f = jnp.maximum(jnp.asarray(num_fg, jnp.float32), 1.0)
    iou_loss = sums[0] / num_fg_f
    conf_loss = sums[1] / num_fg_f
    cls_loss = sums[2] / num_fg_f
    l1_loss = sums[3] / num_fg_f if use_l1_loss else jnp.float32(0.0)
    w_iou = jnp.float32(reg_weight) * iou_loss
    loss = w_iou + conf_loss + cls_loss + l1_loss
    return (loss, w_iou, conf_loss, cls_loss, l1_loss)


def yolox_loss_ref(pred, target, *, reg_weight=5.0, loss_type='giou',
                   num_fg=3, use_l1_loss=True):
    """Pure-JAX reference (mirrors the PyTorch module)."""
    num_fg = float(max(num_fg, 1))
    pred = pred.astype(jnp.float32)
    target = target.astype(jnp.float32)
    pb, tb = pred[:, :, :4], target[:, :, :4]

    tl = jnp.maximum(pb[:, :, :2], tb[:, :, :2])
    br = jnp.minimum(pb[:, :, 2:4], tb[:, :, 2:4])
    area_p = jnp.prod(pb[:, :, 2:4] - pb[:, :, :2], axis=2)
    area_g = jnp.prod(tb[:, :, 2:4] - tb[:, :, :2], axis=2)
    en = jnp.prod((tl < br).astype(jnp.float32), axis=2)
    area_i = jnp.prod(br - tl, axis=2) * en
    area_u = area_p + area_g - area_i
    iou = area_i / (area_u + 1e-16)
    if loss_type == 'giou':
        c_tl = jnp.minimum(pb[:, :, :2], tb[:, :, :2])
        c_br = jnp.maximum(pb[:, :, 2:4], tb[:, :, 2:4])
        area_c = jnp.prod(c_br - c_tl, axis=2)
        giou = iou - (area_c - area_u) / jnp.maximum(area_c, 1e-16)
        iou_elems = 1.0 - jnp.clip(giou, -1.0, 1.0)
    else:
        iou_elems = 1.0 - iou ** 2
    iou_loss = jnp.sum(iou_elems) / num_fg

    bce = _bce_with_logits(pred[:, :, 4:], target[:, :, 4:])
    conf_loss = jnp.sum(bce[:, :, 0]) / num_fg
    cls_loss = jnp.sum(bce[:, :, 1:]) / num_fg
    l1_loss = jnp.sum(jnp.abs(pb - tb)) / num_fg if use_l1_loss else jnp.float32(0.0)

    w_iou = reg_weight * iou_loss
    return (w_iou + conf_loss + cls_loss + l1_loss, w_iou, conf_loss, cls_loss, l1_loss)


if __name__ == "__main__":
    loss_fn = jax.jit(yolox_loss)

    # Test 1: the exact example tensors from the PyTorch module.
    pred = jnp.array(
        [[[12, 22, 48, 78, 0.92, 3], [32, 42, 72, 92, 0.85, 2], [58, 68, 98, 118, 0.88, 1]],
         [[17, 27, 53, 83, 0.88, 2], [38, 48, 78, 98, 0.78, 1], [62, 72, 102, 122, 0.95, 3]]],
        dtype=jnp.float32)
    target = jnp.array(
        [[[10, 20, 50, 80, 0.9, 3], [30, 40, 70, 90, 0.8, 2], [60, 70, 100, 120, 0.95, 1]],
         [[15, 25, 55, 85, 0.85, 2], [35, 45, 75, 95, 0.7, 1], [65, 75, 105, 125, 0.92, 3]]],
        dtype=jnp.float32)

    out = jax.block_until_ready(loss_fn(pred, target))
    ref = yolox_loss_ref(pred, target)
    for a, b in zip(out, ref):
        a, b = float(a), float(b)
        assert abs(a - b) <= 1e-2 + 1e-3 * abs(b), (a, b)

    # Test 2: deterministic PRNGKey(0) inputs at a slightly larger shape
    # (B=2, N=8, K=4+1+6=11 -> num_classes=6), exercising >1 cls channel.
    key = jax.random.PRNGKey(0)
    k1, k2 = jax.random.split(key)
    pred_r = jax.random.uniform(k1, (2, 8, 11), dtype=jnp.float32) * 50.0
    target_r = jax.random.uniform(k2, (2, 8, 11), dtype=jnp.float32) * 50.0
    out_r = jax.block_until_ready(loss_fn(pred_r, target_r))
    ref_r = yolox_loss_ref(pred_r, target_r)
    for a, b in zip(out_r, ref_r):
        a, b = float(a), float(b)
        assert abs(a - b) <= 1e-2 + 1e-3 * abs(b), (a, b)

    print("KERNEL_OK")
</pallas_src>

<mosaic_0001>
module attributes {stable_mosaic.version = 11 : i64} {
  func.func @_yolox_loss_kernel(%arg0: i32, %arg1: i32, %arg2: memref<6x8x128xf32, #tpu.memory_space<vmem>>, %arg3: memref<6x8x128xf32, #tpu.memory_space<vmem>>, %arg4: memref<4x1x128xf32, #tpu.memory_space<vmem>>) attributes {dimension_semantics = [#tpu.dimension_semantics<parallel>, #tpu.dimension_semantics<arbitrary>], iteration_bounds = array<i64: 2, 1>, scalar_prefetch = 0 : i64, scratch_operands = 0 : i64, tpu.core_type = #tpu.core_type<tc>, window_params = [{transform_indices = @transform_0, window_bounds = array<i64: 6, 8, 128>}, {transform_indices = @transform_1, window_bounds = array<i64: 6, 8, 128>}, {transform_indices = @transform_2, window_bounds = array<i64: 4, 1, 128>}]} {
    %c0_i32 = arith.constant 0 : i32
    %0 = arith.cmpi eq, %arg1, %c0_i32 : i32
    %1 = arith.extui %0 : i1 to i32
    %c0_i32_0 = arith.constant 0 : i32
    %2 = arith.cmpi ne, %1, %c0_i32_0 : i32
    scf.if %2 {
      %cst_43 = arith.constant 0.000000e+00 : f32
      %110 = vector.broadcast %cst_43 : f32 to vector<4x1x128xf32>
      %c0_44 = arith.constant 0 : index
      %c0_45 = arith.constant 0 : index
      %c0_46 = arith.constant 0 : index
      %111 = vector.load %arg4[%c0_44, %c0_45, %c0_46] : memref<4x1x128xf32, #tpu.memory_space<vmem>>, vector<4x1x128xf32>
      tpu.vector_store %arg4[%c0_44, %c0_45, %c0_46], %110 {strides = array<i32>} : memref<4x1x128xf32, #tpu.memory_space<vmem>>, vector<4x1x128xf32>,
    } else {
    }
    %c0 = arith.constant 0 : index
    %c0_1 = arith.constant 0 : index
    %c0_2 = arith.constant 0 : index
    %3 = vector.load %arg2[%c0, %c0_1, %c0_2] : memref<6x8x128xf32, #tpu.memory_space<vmem>>, vector<1x8x128xf32>
    %4 = vector.shape_cast %3 : vector<1x8x128xf32> to vector<8x128xf32>
    %c1 = arith.constant 1 : index
    %c0_3 = arith.constant 0 : index
    %c0_4 = arith.constant 0 : index
    %5 = vector.load %arg2[%c1, %c0_3, %c0_4] : memref<6x8x128xf32, #tpu.memory_space<vmem>>, vector<1x8x128xf32>
    %6 = vector.shape_cast %5 : vector<1x8x128xf32> to vector<8x128xf32>
    %c2 = arith.constant 2 : index
    %c0_5 = arith.constant 0 : index
    %c0_6 = arith.constant 0 : index
    %7 = vector.load %arg2[%c2, %c0_5, %c0_6] : memref<6x8x128xf32, #tpu.memory_space<vmem>>, vector<1x8x128xf32>
    %8 = vector.shape_cast %7 : vector<1x8x128xf32> to vector<8x128xf32>
    %c3 = arith.constant 3 : index
    %c0_7 = arith.constant 0 : index
    %c0_8 = arith.constant 0 : index
    %9 = vector.load %arg2[%c3, %c0_7, %c0_8] : memref<6x8x128xf32, #tpu.memory_space<vmem>>, vector<1x8x128xf32>
    %10 = vector.shape_cast %9 : vector<1x8x128xf32> to vector<8x128xf32>
    %c0_9 = arith.constant 0 : index
    %c0_10 = arith.constant 0 : index
    %c0_11 = arith.constant 0 : index
    %11 = vector.load %arg3[%c0_9, %c0_10, %c0_11] : memref<6x8x128xf32, #tpu.memory_space<vmem>>, vector<1x8x128xf32>
    %12 = vector.shape_cast %11 : vector<1x8x128xf32> to vector<8x128xf32>
    %c1_12 = arith.constant 1 : index
    %c0_13 = arith.constant 0 : index
    %c0_14 = arith.constant 0 : index
    %13 = vector.load %arg3[%c1_12, %c0_13, %c0_14] : memref<6x8x128xf32, #tpu.memory_space<vmem>>, vector<1x8x128xf32>
    %14 = vector.shape_cast %13 : vector<1x8x128xf32> to vector<8x128xf32>
    %c2_15 = arith.constant 2 : index
    %c0_16 = arith.constant 0 : index
    %c0_17 = arith.constant 0 : index
    %15 = vector.load %arg3[%c2_15, %c0_16, %c0_17] : memref<6x8x128xf32, #tpu.memory_space<vmem>>, vector<1x8x128xf32>
    %16 = vector.shape_cast %15 : vector<1x8x128xf32> to vector<8x128xf32>
    %c3_18 = arith.constant 3 : index
    %c0_19 = arith.constant 0 : index
    %c0_20 = arith.constant 0 : index
    %17 = vector.load %arg3[%c3_18, %c0_19, %c0_20] : memref<6x8x128xf32, #tpu.memory_space<vmem>>, vector<1x8x128xf32>
    %18 = vector.shape_cast %17 : vector<1x8x128xf32> to vector<8x128xf32>
    %19 = arith.maximumf %4, %12 : vector<8x128xf32>
    %20 = arith.maximumf %6, %14 : vector<8x128xf32>
    %21 = arith.minimumf %8, %16 : vector<8x128xf32>
    %22 = arith.minimumf %10, %18 : vector<8x128xf32>
    %23 = arith.subf %8, %4 : vector<8x128xf32>
    %24 = arith.subf %10, %6 : vector<8x128xf32>
    %25 = arith.mulf %23, %24 : vector<8x128xf32>
    %26 = arith.subf %16, %12 : vector<8x128xf32>
    %27 = arith.subf %18, %14 : vector<8x128xf32>
    %28 = arith.mulf %26, %27 : vector<8x128xf32>
    %29 = arith.cmpf olt, %19, %21 : vector<8x128xf32>
    %30 = arith.cmpf olt, %20, %22 : vector<8x128xf32>
    %31 = arith.andi %29, %30 : vector<8x128xi1>
    %32 = arith.extui %31 : vector<8x128xi1> to vector<8x128xi32>
    %33 = arith.sitofp %32 : vector<8x128xi32> to vector<8x128xf32>
    %34 = arith.subf %21, %19 : vector<8x128xf32>
    %35 = arith.subf %22, %20 : vector<8x128xf32>
    %36 = arith.mulf %34, %35 : vector<8x128xf32>
    %37 = arith.mulf %36, %33 : vector<8x128xf32>
    %38 = arith.addf %25, %28 : vector<8x128xf32>
    %39 = arith.subf %38, %37 : vector<8x128xf32>
    %cst = arith.constant 1.000000e-16 : f32
    %40 = vector.broadcast %cst : f32 to vector<8x128xf32>
    %41 = arith.addf %39, %40 : vector<8x128xf32>
    %42 = arith.divf %37, %41 : vector<8x128xf32>
    %43 = arith.minimumf %4, %12 : vector<8x128xf32>
    %44 = arith.minimumf %6, %14 : vector<8x128xf32>
    %45 = arith.maximumf %8, %16 : vector<8x128xf32>
    %46 = arith.maximumf %10, %18 : vector<8x128xf32>
    %47 = arith.subf %45, %43 : vector<8x128xf32>
    %48 = arith.subf %46, %44 : vector<8x128xf32>
    %49 = arith.mulf %47, %48 : vector<8x128xf32>
    %50 = arith.subf %49, %39 : vector<8x128xf32>
    %cst_21 = arith.constant 1.000000e-16 : f32
    %51 = vector.broadcast %cst_21 : f32 to vector<8x128xf32>
    %52 = arith.maximumf %49, %51 : vector<8x128xf32>
    %53 = arith.divf %50, %52 : vector<8x128xf32>
    %54 = arith.subf %42, %53 : vector<8x128xf32>
    %cst_22 = arith.constant -1.000000e+00 : f32
    %cst_23 = arith.constant 1.000000e+00 : f32
    %55 = vector.broadcast %cst_22 : f32 to vector<8x128xf32>
    %56 = arith.maximumf %55, %54 : vector<8x128xf32>
    %57 = vector.broadcast %cst_23 : f32 to vector<8x128xf32>
    %58 = arith.minimumf %57, %56 : vector<8x128xf32>
    %cst_24 = arith.constant 1.000000e+00 : f32
    %59 = vector.broadcast %cst_24 : f32 to vector<8x128xf32>
    %60 = arith.subf %59, %58 : vector<8x128xf32>
    %61 = arith.subf %4, %12 : vector<8x128xf32>
    %62 = math.absf %61 : vector<8x128xf32>
    %63 = arith.subf %6, %14 : vector<8x128xf32>
    %64 = math.absf %63 : vector<8x128xf32>
    %65 = arith.addf %62, %64 : vector<8x128xf32>
    %66 = arith.subf %8, %16 : vector<8x128xf32>
    %67 = math.absf %66 : vector<8x128xf32>
    %68 = arith.addf %65, %67 : vector<8x128xf32>
    %69 = arith.subf %10, %18 : vector<8x128xf32>
    %70 = math.absf %69 : vector<8x128xf32>
    %71 = arith.addf %68, %70 : vector<8x128xf32>
    %c4 = arith.constant 4 : index
    %c0_25 = arith.constant 0 : index
    %c0_26 = arith.constant 0 : index
    %72 = vector.load %arg2[%c4, %c0_25, %c0_26] : memref<6x8x128xf32, #tpu.memory_space<vmem>>, vector<1x8x128xf32>
    %73 = vector.shape_cast %72 : vector<1x8x128xf32> to vector<8x128xf32>
    %c4_27 = arith.constant 4 : index
    %c0_28 = arith.constant 0 : index
    %c0_29 = arith.constant 0 : index
    %74 = vector.load %arg3[%c4_27, %c0_28, %c0_29] : memref<6x8x128xf32, #tpu.memory_space<vmem>>, vector<1x8x128xf32>
    %75 = vector.shape_cast %74 : vector<1x8x128xf32> to vector<8x128xf32>
    %cst_30 = arith.constant 0.000000e+00 : f32
    %76 = vector.broadcast %cst_30 : f32 to vector<8x128xf32>
    %77 = arith.maximumf %73, %76 : vector<8x128xf32>
    %78 = arith.mulf %73, %75 : vector<8x128xf32>
    %79 = arith.subf %77, %78 : vector<8x128xf32>
    %80 = math.absf %73 : vector<8x128xf32>
    %cst_31 = arith.constant 0.000000e+00 : f32
    %81 = vector.broadcast %cst_31 : f32 to vector<8x128xf32>
    %82 = arith.subf %81, %80 : vector<8x128xf32>
    %83 = math.exp %82 : vector<8x128xf32>
    %84 = math.log1p %83 : vector<8x128xf32>
    %85 = arith.addf %79, %84 : vector<8x128xf32>
    %cst_32 = arith.constant 0.000000e+00 : f32
    %86 = vector.broadcast %cst_32 : f32 to vector<8x128xf32>
    %c5 = arith.constant 5 : index
    %c0_33 = arith.constant 0 : index
    %c0_34 = arith.constant 0 : index
    %87 = vector.load %arg2[%c5, %c0_33, %c0_34] : memref<6x8x128xf32, #tpu.memory_space<vmem>>, vector<1x8x128xf32>
    %88 = vector.shape_cast %87 : vector<1x8x128xf32> to vector<8x128xf32>
    %c5_35 = arith.constant 5 : index
    %c0_36 = arith.constant 0 : index
    %c0_37 = arith.constant 0 : index
    %89 = vector.load %arg3[%c5_35, %c0_36, %c0_37] : memref<6x8x128xf32, #tpu.memory_space<vmem>>, vector<1x8x128xf32>
    %90 = vector.shape_cast %89 : vector<1x8x128xf32> to vector<8x128xf32>
    %cst_38 = arith.constant 0.000000e+00 : f32
    %91 = vector.broadcast %cst_38 : f32 to vector<8x128xf32>
    %92 = arith.maximumf %88, %91 : vector<8x128xf32>
    %93 = arith.mulf %88, %90 : vector<8x128xf32>
    %94 = arith.subf %92, %93 : vector<8x128xf32>
    %95 = math.absf %88 : vector<8x128xf32>
    %cst_39 = arith.constant 0.000000e+00 : f32
    %96 = vector.broadcast %cst_39 : f32 to vector<8x128xf32>
    %97 = arith.subf %96, %95 : vector<8x128xf32>
    %98 = math.exp %97 : vector<8x128xf32>
    %99 = math.log1p %98 : vector<8x128xf32>
    %100 = arith.addf %94, %99 : vector<8x128xf32>
    %101 = arith.addf %86, %100 : vector<8x128xf32>
    %c1_i32 = arith.constant 1 : i32
    %102 = arith.muli %arg0, %c1_i32 : i32
    %103 = arith.addi %102, %arg1 : i32
    %c0_i32_40 = arith.constant 0 : i32
    %104 = arith.cmpi sge, %103, %c0_i32_40 : i32
    %true = arith.constant true
    %105 = arith.xori %104, %true : i1
    %106 = arith.extui %105 : i1 to i32
    %c0_i32_41 = arith.constant 0 : i32
    %107 = arith.cmpi ne, %106, %c0_i32_41 : i32
    scf.if %107 {
      %c0_43 = arith.constant 0 : index
      %c0_44 = arith.constant 0 : index
      %c0_45 = arith.constant 0 : index
      %110 = vector.load %arg4[%c0_43, %c0_44, %c0_45] : memref<4x1x128xf32, #tpu.memory_space<vmem>>, vector<1x1x128xf32>
      %111 = vector.shape_cast %110 : vector<1x1x128xf32> to vector<1x128xf32>
      %cst_46 = arith.constant dense<0.000000e+00> : vector<128xf32>
      %112 = vector.multi_reduction <add>, %60, %cst_46 [0] : vector<8x128xf32> to vector<128xf32>
      %113 = vector.shape_cast %112 : vector<128xf32> to vector<1x128xf32>
      %114 = arith.addf %111, %113 : vector<1x128xf32>
      %c0_47 = arith.constant 0 : index
      %c0_48 = arith.constant 0 : index
      %c0_49 = arith.constant 0 : index
      %115 = vector.load %arg4[%c0_47, %c0_48, %c0_49] : memref<4x1x128xf32, #tpu.memory_space<vmem>>, vector<1x1x128xf32>
      %116 = vector.shape_cast %115 : vector<1x1x128xf32> to vector<1x128xf32>
      %117 = vector.shape_cast %114 : vector<1x128xf32> to vector<1x1x128xf32>
      tpu.vector_store %arg4[%c0_47, %c0_48, %c0_49], %117 {strides = array<i32>} : memref<4x1x128xf32, #tpu.memory_space<vmem>>, vector<1x1x128xf32>,
      %c1_50 = arith.constant 1 : index
      %c0_51 = arith.constant 0 : index
      %c0_52 = arith.constant 0 : index
      %118 = vector.load %arg4[%c1_50, %c0_51, %c0_52] : memref<4x1x128xf32, #tpu.memory_space<vmem>>, vector<1x1x128xf32>
      %119 = vector.shape_cast %118 : vector<1x1x128xf32> to vector<1x128xf32>
      %cst_53 = arith.constant dense<0.000000e+00> : vector<128xf32>
      %120 = vector.multi_reduction <add>, %85, %cst_53 [0] : vector<8x128xf32> to vector<128xf32>
      %121 = vector.shape_cast %120 : vector<128xf32> to vector<1x128xf32>
      %122 = arith.addf %119, %121 : vector<1x128xf32>
      %c1_54 = arith.constant 1 : index
      %c0_55 = arith.constant 0 : index
      %c0_56 = arith.constant 0 : index
      %123 = vector.load %arg4[%c1_54, %c0_55, %c0_56] : memref<4x1x128xf32, #tpu.memory_space<vmem>>, vector<1x1x128xf32>
      %124 = vector.shape_cast %123 : vector<1x1x128xf32> to vector<1x128xf32>
      %125 = vector.shape_cast %122 : vector<1x128xf32> to vector<1x1x128xf32>
      tpu.vector_store %arg4[%c1_54, %c0_55, %c0_56], %125 {strides = array<i32>} : memref<4x1x128xf32, #tpu.memory_space<vmem>>, vector<1x1x128xf32>,
      %c2_57 = arith.constant 2 : index
      %c0_58 = arith.constant 0 : index
      %c0_59 = arith.constant 0 : index
      %126 = vector.load %arg4[%c2_57, %c0_58, %c0_59] : memref<4x1x128xf32, #tpu.memory_space<vmem>>, vector<1x1x128xf32>
      %127 = vector.shape_cast %126 : vector<1x1x128xf32> to vector<1x128xf32>
      %cst_60 = arith.constant dense<0.000000e+00> : vector<128xf32>
      %128 = vector.multi_reduction <add>, %101, %cst_60 [0] : vector<8x128xf32> to vector<128xf32>
      %129 = vector.shape_cast %128 : vector<128xf32> to vector<1x128xf32>
      %130 = arith.addf %127, %129 : vector<1x128xf32>
      %c2_61 = arith.constant 2 : index
      %c0_62 = arith.constant 0 : index
      %c0_63 = arith.constant 0 : index
      %131 = vector.load %arg4[%c2_61, %c0_62, %c0_63] : memref<4x1x128xf32, #tpu.memory_space<vmem>>, vector<1x1x128xf32>
      %132 = vector.shape_cast %131 : vector<1x1x128xf32> to vector<1x128xf32>
      %133 = vector.shape_cast %130 : vector<1x128xf32> to vector<1x1x128xf32>
      tpu.vector_store %arg4[%c2_61, %c0_62, %c0_63], %133 {strides = array<i32>} : memref<4x1x128xf32, #tpu.memory_space<vmem>>, vector<1x1x128xf32>,
      %c3_64 = arith.constant 3 : index
      %c0_65 = arith.constant 0 : index
      %c0_66 = arith.constant 0 : index
      %134 = vector.load %arg4[%c3_64, %c0_65, %c0_66] : memref<4x1x128xf32, #tpu.memory_space<vmem>>, vector<1x1x128xf32>
      %135 = vector.shape_cast %134 : vector<1x1x128xf32> to vector<1x128xf32>
      %cst_67 = arith.constant dense<0.000000e+00> : vector<128xf32>
      %136 = vector.multi_reduction <add>, %71, %cst_67 [0] : vector<8x128xf32> to vector<128xf32>
      %137 = vector.shape_cast %136 : vector<128xf32> to vector<1x128xf32>
      %138 = arith.addf %135, %137 : vector<1x128xf32>
      %c3_68 = arith.constant 3 : index
      %c0_69 = arith.constant 0 : index
      %c0_70 = arith.constant 0 : index
      %139 = vector.load %arg4[%c3_68, %c0_69, %c0_70] : memref<4x1x128xf32, #tpu.memory_space<vmem>>, vector<1x1x128xf32>
      %140 = vector.shape_cast %139 : vector<1x1x128xf32> to vector<1x128xf32>
      %141 = vector.shape_cast %138 : vector<1x128xf32> to vector<1x1x128xf32>
      tpu.vector_store %arg4[%c3_68, %c0_69, %c0_70], %141 {strides = array<i32>} : memref<4x1x128xf32, #tpu.memory_space<vmem>>, vector<1x1x128xf32>,
    } else {
    }
    %108 = arith.extui %104 : i1 to i32
    %c0_i32_42 = arith.constant 0 : i32
    %109 = arith.cmpi ne, %108, %c0_i32_42 : i32
    scf.if %109 {
      %110 = tpu.iota {dimensions = array<i32: 0>} : vector<8x128xi32>
      %111 = tpu.iota {dimensions = array<i32: 1>} : vector<8x128xi32>
      %c8_i32 = arith.constant 8 : i32
      %112 = arith.muli %103, %c8_i32 : i32
      %113 = vector.broadcast %112 : i32 to vector<8x128xi32>
      %114 = arith.addi %113, %110 : vector<8x128xi32>
      %c128_i32 = arith.constant 128 : i32
      %115 = vector.broadcast %c128_i32 : i32 to vector<8x128xi32>
      %116 = arith.muli %114, %115 : vector<8x128xi32>
      %117 = arith.addi %116, %111 : vector<8x128xi32>
      %c6_i32 = arith.constant 6 : i32
      %118 = vector.broadcast %c6_i32 : i32 to vector<8x128xi32>
      %119 = arith.cmpi slt, %117, %118 : vector<8x128xi32>
      %120 = arith.extui %119 : vector<8x128xi1> to vector<8x128xi32>
      %121 = arith.sitofp %120 : vector<8x128xi32> to vector<8x128xf32>
      %122 = arith.mulf %60, %121 : vector<8x128xf32>
      %c0_43 = arith.constant 0 : index
      %c0_44 = arith.constant 0 : index
      %c0_45 = arith.constant 0 : index
      %123 = vector.load %arg4[%c0_43, %c0_44, %c0_45] : memref<4x1x128xf32, #tpu.memory_space<vmem>>, vector<1x1x128xf32>
      %124 = vector.shape_cast %123 : vector<1x1x128xf32> to vector<1x128xf32>
      %cst_46 = arith.constant dense<0.000000e+00> : vector<128xf32>
      %125 = vector.multi_reduction <add>, %122, %cst_46 [0] : vector<8x128xf32> to vector<128xf32>
      %126 = vector.shape_cast %125 : vector<128xf32> to vector<1x128xf32>
      %127 = arith.addf %124, %126 : vector<1x128xf32>
      %c0_47 = arith.constant 0 : index
      %c0_48 = arith.constant 0 : index
      %c0_49 = arith.constant 0 : index
      %128 = vector.load %arg4[%c0_47, %c0_48, %c0_49] : memref<4x1x128xf32, #tpu.memory_space<vmem>>, vector<1x1x128xf32>
      %129 = vector.shape_cast %128 : vector<1x1x128xf32> to vector<1x128xf32>
      %130 = vector.shape_cast %127 : vector<1x128xf32> to vector<1x1x128xf32>
      tpu.vector_store %arg4[%c0_47, %c0_48, %c0_49], %130 {strides = array<i32>} : memref<4x1x128xf32, #tpu.memory_space<vmem>>, vector<1x1x128xf32>,
      %131 = arith.mulf %85, %121 : vector<8x128xf32>
      %c1_50 = arith.constant 1 : index
      %c0_51 = arith.constant 0 : index
      %c0_52 = arith.constant 0 : index
      %132 = vector.load %arg4[%c1_50, %c0_51, %c0_52] : memref<4x1x128xf32, #tpu.memory_space<vmem>>, vector<1x1x128xf32>
      %133 = vector.shape_cast %132 : vector<1x1x128xf32> to vector<1x128xf32>
      %cst_53 = arith.constant dense<0.000000e+00> : vector<128xf32>
      %134 = vector.multi_reduction <add>, %131, %cst_53 [0] : vector<8x128xf32> to vector<128xf32>
      %135 = vector.shape_cast %134 : vector<128xf32> to vector<1x128xf32>
      %136 = arith.addf %133, %135 : vector<1x128xf32>
      %c1_54 = arith.constant 1 : index
      %c0_55 = arith.constant 0 : index
      %c0_56 = arith.constant 0 : index
      %137 = vector.load %arg4[%c1_54, %c0_55, %c0_56] : memref<4x1x128xf32, #tpu.memory_space<vmem>>, vector<1x1x128xf32>
      %138 = vector.shape_cast %137 : vector<1x1x128xf32> to vector<1x128xf32>
      %139 = vector.shape_cast %136 : vector<1x128xf32> to vector<1x1x128xf32>
      tpu.vector_store %arg4[%c1_54, %c0_55, %c0_56], %139 {strides = array<i32>} : memref<4x1x128xf32, #tpu.memory_space<vmem>>, vector<1x1x128xf32>,
      %140 = arith.mulf %101, %121 : vector<8x128xf32>
      %c2_57 = arith.constant 2 : index
      %c0_58 = arith.constant 0 : index
      %c0_59 = arith.constant 0 : index
      %141 = vector.load %arg4[%c2_57, %c0_58, %c0_59] : memref<4x1x128xf32, #tpu.memory_space<vmem>>, vector<1x1x128xf32>
      %142 = vector.shape_cast %141 : vector<1x1x128xf32> to vector<1x128xf32>
      %cst_60 = arith.constant dense<0.000000e+00> : vector<128xf32>
      %143 = vector.multi_reduction <add>, %140, %cst_60 [0] : vector<8x128xf32> to vector<128xf32>
      %144 = vector.shape_cast %143 : vector<128xf32> to vector<1x128xf32>
      %145 = arith.addf %142, %144 : vector<1x128xf32>
      %c2_61 = arith.constant 2 : index
      %c0_62 = arith.constant 0 : index
      %c0_63 = arith.constant 0 : index
      %146 = vector.load %arg4[%c2_61, %c0_62, %c0_63] : memref<4x1x128xf32, #tpu.memory_space<vmem>>, vector<1x1x128xf32>
      %147 = vector.shape_cast %146 : vector<1x1x128xf32> to vector<1x128xf32>
      %148 = vector.shape_cast %145 : vector<1x128xf32> to vector<1x1x128xf32>
      tpu.vector_store %arg4[%c2_61, %c0_62, %c0_63], %148 {strides = array<i32>} : memref<4x1x128xf32, #tpu.memory_space<vmem>>, vector<1x1x128xf32>,
      %149 = arith.mulf %71, %121 : vector<8x128xf32>
      %c3_64 = arith.constant 3 : index
      %c0_65 = arith.constant 0 : index
      %c0_66 = arith.constant 0 : index
      %150 = vector.load %arg4[%c3_64, %c0_65, %c0_66] : memref<4x1x128xf32, #tpu.memory_space<vmem>>, vector<1x1x128xf32>
      %151 = vector.shape_cast %150 : vector<1x1x128xf32> to vector<1x128xf32>
      %cst_67 = arith.constant dense<0.000000e+00> : vector<128xf32>
      %152 = vector.multi_reduction <add>, %149, %cst_67 [0] : vector<8x128xf32> to vector<128xf32>
      %153 = vector.shape_cast %152 : vector<128xf32> to vector<1x128xf32>
      %154 = arith.addf %151, %153 : vector<1x128xf32>
      %c3_68 = arith.constant 3 : index
      %c0_69 = arith.constant 0 : index
      %c0_70 = arith.constant 0 : index
      %155 = vector.load %arg4[%c3_68, %c0_69, %c0_70] : memref<4x1x128xf32, #tpu.memory_space<vmem>>, vector<1x1x128xf32>
      %156 = vector.shape_cast %155 : vector<1x1x128xf32> to vector<1x128xf32>
      %157 = vector.shape_cast %154 : vector<1x128xf32> to vector<1x1x128xf32>
      tpu.vector_store %arg4[%c3_68, %c0_69, %c0_70], %157 {strides = array<i32>} : memref<4x1x128xf32, #tpu.memory_space<vmem>>, vector<1x1x128xf32>,
    } else {
    }
    return
  }
  func.func @transform_0(%arg0: i32, %arg1: i32) -> (i32, i32, i32) {
    %c1_i32 = arith.constant 1 : i32
    %0 = arith.muli %arg0, %c1_i32 : i32
    %1 = arith.addi %0, %arg1 : i32
    %c0_i32 = arith.constant 0 : i32
    %c0_i32_0 = arith.constant 0 : i32
    %c0_i32_1 = arith.constant 0 : i32
    return %c0_i32, %1, %c0_i32_0 : i32, i32, i32
  }
  func.func @transform_1(%arg0: i32, %arg1: i32) -> (i32, i32, i32) {
    %c1_i32 = arith.constant 1 : i32
    %0 = arith.muli %arg0, %c1_i32 : i32
    %1 = arith.addi %0, %arg1 : i32
    %c0_i32 = arith.constant 0 : i32
    %c0_i32_0 = arith.constant 0 : i32
    %c0_i32_1 = arith.constant 0 : i32
    return %c0_i32, %1, %c0_i32_0 : i32, i32, i32
  }
  func.func @transform_2(%arg0: i32, %arg1: i32) -> (i32, i32, i32) {
    %c0_i32 = arith.constant 0 : i32
    %c0_i32_0 = arith.constant 0 : i32
    %c0_i32_1 = arith.constant 0 : i32
    return %arg0, %c0_i32, %c0_i32_0 : i32, i32, i32
  }
}

</mosaic_0001>

<bundles_post_ra>
// kernel: yolox_loss.1
= control target key start
LH: loop header
LB: loop body
LE: loop exit
PB: predicated region body
PF: predicated region fallthrough
CT: control target
= control target key end

     0   :  { %s746_s9 = smov 0   ;;  %s748_s10 = smov 0   ;;  %s875_s0 = inlined_call_operand.vmem [shape: f32[6,16,128], index: 0, kind: input, shape index: {}]   ;;  %s876_s1 = inlined_call_operand.vmem [shape: f32[6,16,128], index: 1, kind: input, shape index: {}]   ;;  %s877_s2 = inlined_call_operand.vmem [shape: f32[8,1,128], index: 2, kind: output, shape index: {}]  }
   0x1   :  { %s750_s11 = smov 0   ;;  %s752_s12 = smov 0  }
   0x2   :  { %s754_s13 = smov 0  }
   0x3 LB: > { %s24_s14 = sadd.s32 1, %s723_s12  ;;  %p40_p1 = scmp.ne.s32.totalorder %s715_s10, %s711_s9  ;;  %s727_s13 = sphi %s754_s13, %s12_s13   ;;  %s723_s12 = sphi %s752_s12, %s882_s12   ;;  %s719_s11 = sphi %s750_s11, %s881_s11   ;;  %s715_s10 = sphi %s748_s10, %s880_s10   ;;  %s711_s9 = sphi %s746_s9, %s879_s9  }
   0x4   : > { %p26_p0 = scmp.ge.s32.totalorder %s24_s14, 2  ;;  %p41_p2 = scmp.eq.s32.totalorder %s727_s13, 0 }
   0x5   : > { %s33_s17 = sadd.s32 1, %s715_s10  ;;  %p597_p5 = scmp.ge.s32.totalorder %s727_s13, 2 }
   0x6   : > { %s884_s14 = smov (%p26_p0, %s24_s14), 0  ;;  %p777_p3 = por %p41_p2, %p40_p1 }
   0x7   : > { %s30_s16 = ssub.s32 %s723_s12, %s884_s14  ;;  %120 = sbr.rel (%p597_p5) target bundleno = 28 (0x1c), region = 16 }
   0x8   : > { %p31_p4 = scmp.eq.s32.totalorder %s30_s16, 0 }
   0xa   : > { %s785_s18 = scalar_select %p31_p4, %s715_s10, %s33_s17  }
   0xe   : > { %123 = sbr.rel (!%p777_p3) target bundleno = 21 (0x15), region = 20  ;;  %s125_s19 = sand.u32 (%p777_p3), 1, %s715_s10  }
   0xf   : > { %s598_s20 = sshll.u32 (%p777_p3), %s723_s12, 3  ;;  %s632_s21 = smul.u32 (%p777_p3), 48, %s125_s19 }
  0x10   : > { %s130_s24 = scalar_lea.vmem (%p777_p3), %s875_s0, %s598_s20 }
  0x11   : > { %v168_v0 = vld [vmem:[%s130_s24] sm:$0xff] (%p777_p3)  ;;  %v170_v1 = vld [vmem:[%s130_s24 + $0x10] sm:$0xff] (%p777_p3)  ;;  %s127_s25 = scalar_lea.vmem (%p777_p3), [#allocation2], %s632_s21 }
  0x12   : > { %v172_v2 = vld [vmem:[%s130_s24 + $0x20] sm:$0xff] (%p777_p3)  ;;  %v174_v3 = vld [vmem:[%s130_s24 + $0x30] sm:$0xff] (%p777_p3)  ;;  %169 = vst [vmem:[%s127_s25] sm:$0xff] (%p777_p3), %v168_v0  ;;  %171 = vst [vmem:[%s127_s25 + $0x8] sm:$0xff] (%p777_p3), %v170_v1 }
  0x13   : > { %v176_v4 = vld [vmem:[%s130_s24 + $0x40] sm:$0xff] (%p777_p3)  ;;  %v178_v5 = vld [vmem:[%s130_s24 + $0x50] sm:$0xff] (%p777_p3)  ;;  %173 = vst [vmem:[%s127_s25 + $0x10] sm:$0xff] (%p777_p3), %v172_v2  ;;  %175 = vst [vmem:[%s127_s25 + $0x18] sm:$0xff] (%p777_p3), %v174_v3 }
  0x14   : > { %177 = vst [vmem:[%s127_s25 + $0x20] sm:$0xff] (%p777_p3), %v176_v4  ;;  %179 = vst [vmem:[%s127_s25 + $0x28] sm:$0xff] (%p777_p3), %v178_v5 }
  0x15 PF: > { %185 = sbr.rel (!%p777_p3) target bundleno = 28 (0x1c), region = 58  ;;  %s187_s26 = sand.u32 (%p777_p3), 1, %s715_s10  }
  0x16   : > { %s599_s27 = sshll.u32 (%p777_p3), %s723_s12, 3  ;;  %s633_s28 = smul.u32 (%p777_p3), 48, %s187_s26 }
  0x17   : > { %s192_s3 = scalar_lea.vmem (%p777_p3), %s876_s1, %s599_s27 }
  0x18   : > { %v230_v6 = vld [vmem:[%s192_s3] sm:$0xff] (%p777_p3)  ;;  %v232_v7 = vld [vmem:[%s192_s3 + $0x10] sm:$0xff] (%p777_p3)  ;;  %s189_s4 = scalar_lea.vmem (%p777_p3), [#allocation3], %s633_s28 }
  0x19   : > { %v234_v8 = vld [vmem:[%s192_s3 + $0x20] sm:$0xff] (%p777_p3)  ;;  %v236_v9 = vld [vmem:[%s192_s3 + $0x30] sm:$0xff] (%p777_p3)  ;;  %231 = vst [vmem:[%s189_s4] sm:$0xff] (%p777_p3), %v230_v6  ;;  %233 = vst [vmem:[%s189_s4 + $0x8] sm:$0xff] (%p777_p3), %v232_v7 }
  0x1a   : > { %v238_v10 = vld [vmem:[%s192_s3 + $0x40] sm:$0xff] (%p777_p3)  ;;  %v240_v11 = vld [vmem:[%s192_s3 + $0x50] sm:$0xff] (%p777_p3)  ;;  %235 = vst [vmem:[%s189_s4 + $0x10] sm:$0xff] (%p777_p3), %v234_v8  ;;  %237 = vst [vmem:[%s189_s4 + $0x18] sm:$0xff] (%p777_p3), %v236_v9 }
  0x1b   : > { %239 = vst [vmem:[%s189_s4 + $0x20] sm:$0xff] (%p777_p3), %v238_v10  ;;  %241 = vst [vmem:[%s189_s4 + $0x28] sm:$0xff] (%p777_p3), %v240_v11 }
  0x1c PF: > { %p600_p6 = scmp.ge.s32.totalorder %s727_s13, 1  ;;  %p246_p7 = scmp.lt.s32.totalorder %s727_s13, 3 }
  0x1e   : > { %p247_p8 = pnand %p600_p6, %p246_p7 }
  0x1f   : > { %s253_s5 = sand.u32 (!%p247_p8), 1, %s711_s9   ;;  %s601_s6 = sshll.u32 (!%p247_p8), %s719_s11, 2  ;;  %v729_v25 = vmov (!%p247_p8), 0.0  }
  0x20   : > { %250 = sbr.rel (%p247_p8) target bundleno = 129 (0x81), region = 96  ;;  %p287_p9 = scmp.lt.s32.totalorder (!%p247_p8), %s601_s6, 7 }
  0x21   : > { %s634_s7 = smul.u32 (!%p247_p8), 48, %s253_s5  ;;  %p614_p10 = scmp.ge.s32.totalorder (!%p247_p8), %s719_s11, 0 }
  0x23   : > { %s806_s8 = scalar_lea.vmem (!%p247_p8), [#allocation2], %s634_s7  ;;  %s812_s15 = scalar_lea.vmem (!%p247_p8), [#allocation3], %s634_s7 }
  0x24   : > { %v299_v12 = vld [vmem:[%s806_s8] sm:$0xff] (!%p247_p8)  ;;  %v602_v13 = vld [vmem:[%s806_s8 + $0x8] sm:$0xff] (!%p247_p8)  ;;  %v603_v14 = vld [vmem:[%s806_s8 + $0x10] sm:$0xff] (!%p247_p8) }
  0x25   : > { %v604_v15 = vld [vmem:[%s806_s8 + $0x18] sm:$0xff] (!%p247_p8)  ;;  %v306_v16 = vld [vmem:[%s812_s15] sm:$0xff] (!%p247_p8)  ;;  %v605_v17 = vld [vmem:[%s812_s15 + $0x8] sm:$0xff] (!%p247_p8)  ;;  %v317_v18 = vsub.f32 (!%p247_p8), %v603_v14, %v299_v12 }
  0x26   : > { %v606_v19 = vld [vmem:[%s812_s15 + $0x10] sm:$0xff] (!%p247_p8)  ;;  %v607_v20 = vld [vmem:[%s812_s15 + $0x18] sm:$0xff] (!%p247_p8)  ;;  %v313_v21 = vmax.f32 (!%p247_p8), %v299_v12, %v306_v16  ;;  %v314_v22 = vmax.f32 (!%p247_p8), %v602_v13, %v605_v17  ;;  %v318_v23 = vsub.f32 (!%p247_p8), %v604_v15, %v602_v13  ;;  %v337_v24 = vmin.f32 (!%p247_p8), %v299_v12, %v306_v16  ;;  %v610_v44 = vld [vmem:[%s806_s8 + $0x20] sm:$0xff] (!%p247_p8) }
  0x27   : > { %s886_s6 = smov (!%p287_p9, %s601_s6), 7  ;;  %v315_v26 = vmin.f32 %v603_v14, %v606_v19  ;;  %v316_v27 = vmin.f32 %v604_v15, %v607_v20  ;;  %v320_v28 = vsub.f32 %v606_v19, %v306_v16  ;;  %v321_v29 = vsub.f32 %v607_v20, %v605_v17  ;;  %v612_v51 = vld [vmem:[%s806_s8 + $0x28] sm:$0xff] }
  0x28   : > { %s819_s17 = scalar_lea.vmem %s877_s2, %s886_s6  ;;  %v319_v30 = vmul.f32 %v318_v23, %v317_v18  ;;  %v338_v31 = vmin.f32 %v602_v13, %v605_v17  ;;  %v339_v32 = vmax.f32 %v603_v14, %v606_v19  ;;  %v340_v33 = vmax.f32 %v604_v15, %v607_v20 }
  0x29   : > { %295 = vst [vmem:[%s819_s17] sm:$0x1] %v729_v25  ;;  %296 = vst [vmem:[%s819_s17 + $0x1] sm:$0x1] %v729_v25  ;;  %v322_v34 = vmul.f32 %v321_v29, %v320_v28  ;;  %vm323_vm0 = vcmp.lt.f32.partialorder %v313_v21, %v315_v26  ;;  %vm324_vm1 = vcmp.lt.f32.partialorder %v314_v22, %v316_v27  ;;  %v370_v54 = vand.u32 2147483647, %v610_v44 }
  0x2a   : > { %v328_v35 = vsub.f32 %v315_v26, %v313_v21  ;;  %297 = vst [vmem:[%s819_s17 + $0x2] sm:$0x1] %v729_v25  ;;  %vm325_vm2 = vmand %vm323_vm0, %vm324_vm1  ;;  %v329_v36 = vsub.f32 %v316_v27, %v314_v22  ;;  %v341_v37 = vsub.f32 %v339_v32, %v337_v24  ;;  %v342_v38 = vsub.f32 %v340_v33, %v338_v31 }
  0x2b   : > { %v352_v39 = vsub.f32 %v299_v12, %v306_v16  ;;  %298 = vst [vmem:[%s819_s17 + $0x3] sm:$0x1] %v729_v25  ;;  %v608_v40 = vsel %vm325_vm2, 1.0, %v729_v25  ;;  %v332_v41 = vadd.f32 %v322_v34, %v319_v30  ;;  %v354_v42 = vsub.f32 %v602_v13, %v605_v17  ;;  %v611_v16 = vld [vmem:[%s812_s15 + $0x20] sm:$0xff]  ;;  %v613_v17 = vld [vmem:[%s812_s15 + $0x28] sm:$0xff] }
  0x2c   : > { %v357_v43 = vsub.f32 %v603_v14, %v606_v19  ;;  %v330_v45 = vmul.f32 %v329_v36, %v328_v35  ;;  %v343_v46 = vmul.f32 %v342_v38, %v341_v37  ;;  %v360_v48 = vsub.f32 %v604_v15, %v607_v20 }
  0x2d   : > { %v353_v47 = vand.u32 2147483647, %v352_v39  ;;  %v355_v49 = vand.u32 2147483647, %v354_v42  ;;  %v371_v58 = vsub.f32 0.0, %v370_v54  ;;  %v367_v19 = vmax.f32 %v610_v44, 0.0 }
  0x2e   : > { %v358_v50 = vand.u32 2147483647, %v357_v43  ;;  %v331_v52 = vmul.f32 %v608_v40, %v330_v45  ;;  %v345_v53 = vmax.f32 %v343_v46, 1e-16  ;;  %v361_v56 = vand.u32 2147483647, %v360_v48 }
  0x2f   : > { %v356_v55 = vadd.f32 %v355_v49, %v353_v47  ;;  %v391_v59 = vand.u32 2147483647, %v612_v51  ;;  %v372_v62 = vmul.f32 1.442695, %v371_v58  ;;  %v368_v20 = vmul.f32 %v611_v16, %v610_v44 }
  0x30   : > { %v333_v57 = vsub.f32 %v332_v41, %v331_v52  ;;  %677 = vrcp.f32 %v345_v53  ;;  %v388_v23 = vmax.f32 %v612_v51, 0.0  ;;  %v389_v24 = vmul.f32 %v613_v17, %v612_v51  ;;  %v412_v47 = vld [vmem:[%s819_s17] sm:$0x1] (!%p614_p10) }
  0x31   : > { %v359_v60 = vadd.f32 %v358_v50, %v356_v55  ;;  %v392_v63 = vsub.f32 0.0, %v391_v59  ;;  %v369_v28 = vsub.f32 %v367_v19, %v368_v20 }
  0x32   : > { %v334_v61 = vadd.f32 1e-16, %v333_v57  ;;  %v344_v2 = vsub.f32 %v343_v46, %v333_v57  ;;  %v390_v32 = vsub.f32 %v388_v23, %v389_v24  ;;  %v615_v57 = vld [vmem:[%s819_s17 + $0x1] sm:$0x1] (!%p614_p10) }
  0x33   : > { %v829_v0 = vadd.f32 %v361_v56, %v359_v60  ;;  %v393_v1 = vmul.f32 1.442695, %v392_v63 }
  0x34   : > { %679 = vrcp.f32 %v334_v61 }
  0x35   : > { %681 = vpow2.f32 %v372_v62  ;;  %v443_v55 = vrot.slane (!%p614_p10), %v829_v0, 4 }
  0x36   : > { %683 = vpow2.f32 %v393_v1  ;;  %v617_v1 = vld [vmem:[%s819_s17 + $0x2] sm:$0x1] (!%p614_p10) }
  0x37   : > { %v444_v59 = vadd.f32 (!%p614_p10), %v443_v55, %v829_v0 }
  0x39   : > { %v445_v61 = vrot.slane (!%p614_p10), %v444_v59, 2 }
  0x3a   : > { %v678_v3 = vpop.eup %677 }
  0x3b   : > { %v347_v4 = vmul.f32 %v678_v3, %v344_v2  ;;  %v446_v63 = vadd.f32 (!%p614_p10), %v445_v61, %v444_v59 }
  0x3d   : > { %v447_v3 = vrot.slane (!%p614_p10), %v446_v63, 1 }
  0x3e   : > { %v680_v5 = vpop.eup %679 }
  0x3f   : > { %v682_v6 = vpop.eup %681  ;;  %v336_v7 = vmul.f32 %v680_v5, %v331_v52  ;;  %v619_v5 = vld [vmem:[%s819_s17 + $0x3] sm:$0x1] (!%p614_p10) }
  0x40   : > { %v684_v8 = vpop.eup %683  ;;  %v374_v9 = vadd.f32 1.0, %v682_v6  ;;  %v377_v13 = vmul.f32 -0.5, %v682_v6  ;;  %v380_v21 = vand.u32 2147483647, %v682_v6 }
  0x41   : > { %v348_v10 = vsub.f32 %v336_v7, %v347_v4  ;;  %v395_v11 = vadd.f32 1.0, %v684_v8  ;;  %v398_v14 = vmul.f32 -0.5, %v684_v8  ;;  %v401_v25 = vand.u32 2147483647, %v684_v8 }
  0x42   : > { %685 = vlog2.f32 %v374_v9  ;;  %v378_v18 = vadd.f32 1.0, %v377_v13  ;;  %vm381_vm3 = vcmp.lt.f32.partialorder %v380_v21, 0.0004427343  ;;  %v448_v4 = vadd.f32 (!%p614_p10), %v447_v3, %v446_v63 }
  0x43   : > { %v609_v12 = vclamps-f32 %v348_v10, 1.0  ;;  %687 = vlog2.f32 %v395_v11  ;;  %v399_v22 = vadd.f32 1.0, %v398_v14  ;;  %vm402_vm4 = vcmp.lt.f32.partialorder %v401_v25, 0.0004427343 }
  0x44   : > { %v379_v26 = vmul.f32 %v682_v6, %v378_v18  ;;  %v449_v6 = vadd.f32 (!%p614_p10), %v619_v5, %v448_v4 }
  0x45   : > { %v831_v15 = vsub.f32 1.0, %v609_v12  ;;  %v400_v29 = vmul.f32 %v684_v8, %v399_v22 }
  0x46   : > { %620 = vst [vmem:[%s819_s17 + $0x3] sm:$0x1] (!%p614_p10), %v449_v6 }
  0x47   : > { %v413_v38 = vrot.slane (!%p614_p10), %v831_v15, 4 }
  0x49   : > { %v414_v40 = vadd.f32 (!%p614_p10), %v413_v38, %v831_v15 }
  0x4b   : > { %411 = sbr.rel (%p614_p10) target bundleno = 98 (0x62), region = 112  ;;  %v415_v42 = vrot.slane (!%p614_p10), %v414_v40, 2 }
  0x4c   : > { %v686_v27 = vpop.eup %685 }
  0x4d   : > { %v688_v30 = vpop.eup %687  ;;  %v376_v31 = vmul.f32 0.6931472, %v686_v27  ;;  %v416_v43 = vadd.f32 (!%p614_p10), %v415_v42, %v414_v40 }
  0x4e   : > { %v397_v33 = vmul.f32 0.6931472, %v688_v30 }
  0x4f   : > { %v382_v34 = vsel %vm381_vm3, %v379_v26, %v376_v31  ;;  %v417_v45 = vrot.slane (!%p614_p10), %v416_v43, 1 }
  0x50   : > { %v383_v35 = vadd.f32 %v382_v34, %v369_v28  ;;  %v403_v36 = vsel %vm402_vm4, %v400_v29, %v397_v33 }
  0x51   : > { %v404_v37 = vadd.f32 %v403_v36, %v390_v32  ;;  %v418_v48 = vadd.f32 (!%p614_p10), %v417_v45, %v416_v43 }
  0x52   : > { %v423_v39 = vrot.slane %v383_v35, 4 }
  0x53   : > { %v433_v46 = vrot.slane %v404_v37, 4  ;;  %v419_v50 = vadd.f32 %v418_v48, %v412_v47 }
  0x54   : > { %v424_v41 = vadd.f32 %v423_v39, %v383_v35 }
  0x55   : > { %v434_v51 = vadd.f32 %v433_v46, %v404_v37  ;;  %420 = vst [vmem:[%s819_s17] sm:$0x1] %v419_v50 }
  0x56   : > { %v425_v44 = vrot.slane %v424_v41, 2 }
  0x57   : > { %v435_v53 = vrot.slane %v434_v51, 2 }
  0x58   : > { %v426_v49 = vadd.f32 %v425_v44, %v424_v41 }
  0x59   : > { %v436_v56 = vadd.f32 %v435_v53, %v434_v51 }
  0x5a   : > { %v427_v52 = vrot.slane %v426_v49, 1 }
  0x5b   : > { %v437_v60 = vrot.slane %v436_v56, 1 }
  0x5c   : > { %v428_v54 = vadd.f32 %v427_v52, %v426_v49 }
  0x5d   : > { %v438_v62 = vadd.f32 %v437_v60, %v436_v56 }
  0x5e   : > { %v429_v58 = vadd.f32 %v615_v57, %v428_v54 }
  0x5f   : > { %v439_v2 = vadd.f32 %v617_v1, %v438_v62 }
  0x60   : > { %616 = vst [vmem:[%s819_s17 + $0x1] sm:$0x1] %v429_v58 }
  0x61   : > { %618 = vst [vmem:[%s819_s17 + $0x2] sm:$0x1] %v439_v2 }
  0x62 PF: > { %p621_p11 = scmp.lt.s32.totalorder %s719_s11, 0 }
  0x63   : > { %v454_v7 = vlaneseq (!%p621_p11)  ;;  %s622_s19 = sshll.u32 (!%p621_p11), %s719_s11, 3  ;;  %v730_v14 = vmov (!%p621_p11), 0.0   ;;  %v467_v29 = vld [vmem:[%s819_s17] sm:$0x1] (!%p621_p11) }
  0x64   : > { %453 = sbr.rel (%p621_p11) target bundleno = 129 (0x81), region = 116  ;;  %v459_v8 = vstv (!%p621_p11), %s622_s19 }
  0x65   : > { %v455_v9 = vshrl.u32 (!%p621_p11), %v454_v7, 7  ;;  %v457_v10 = vand.u32 (!%p621_p11), 127, %v454_v7 }
  0x67   : > { %v460_v11 = vadd.s32 (!%p621_p11), %v459_v8, %v455_v9  ;;  %v624_v39 = vld [vmem:[%s819_s17 + $0x1] sm:$0x1] (!%p621_p11) }
  0x68   : > { %v626_v46 = vld [vmem:[%s819_s17 + $0x2] sm:$0x1] (!%p621_p11) }
  0x69   : > { %v461_v12 = vmul.u32 (!%p621_p11), 128, %v460_v11 }
  0x6b   : > { %v462_v13 = vadd.s32 %v461_v12, %v457_v10 }
  0x6d   : > { %vm463_vm5 = vcmp.lt.s32.totalorder %v462_v13, 6 }
  0x6e   : > { %v623_v16 = vsel %vm463_vm5, 1.0, %v730_v14 }
  0x6f   : > { %v466_v17 = vmul.f32 %v623_v16, %v831_v15  ;;  %v476_v18 = vmul.f32 %v623_v16, %v383_v35  ;;  %v487_v24 = vmul.f32 %v623_v16, %v404_v37  ;;  %v498_v34 = vmul.f32 %v623_v16, %v829_v0  ;;  %v628_v0 = vld [vmem:[%s819_s17 + $0x3] sm:$0x1] }
  0x71   : > { %v468_v19 = vrot.slane %v466_v17, 4  ;;  %v479_v20 = vrot.slane %v476_v18, 4  ;;  %v490_v28 = vrot.slane %v487_v24, 4  ;;  %v501_v37 = vrot.slane %v498_v34, 4 }
  0x73   : > { %v469_v21 = vadd.f32 %v468_v19, %v466_v17  ;;  %v480_v22 = vadd.f32 %v479_v20, %v476_v18  ;;  %v491_v33 = vadd.f32 %v490_v28, %v487_v24  ;;  %v502_v41 = vadd.f32 %v501_v37, %v498_v34 }
  0x75   : > { %v470_v23 = vrot.slane %v469_v21, 2  ;;  %v481_v26 = vrot.slane %v480_v22, 2  ;;  %v492_v35 = vrot.slane %v491_v33, 2  ;;  %v503_v43 = vrot.slane %v502_v41, 2 }
  0x77   : > { %v471_v25 = vadd.f32 %v470_v23, %v469_v21  ;;  %v482_v31 = vadd.f32 %v481_v26, %v480_v22  ;;  %v493_v38 = vadd.f32 %v492_v35, %v491_v33  ;;  %v504_v45 = vadd.f32 %v503_v43, %v502_v41 }
  0x79   : > { %v472_v27 = vrot.slane %v471_v25, 1  ;;  %v483_v15 = vrot.slane %v482_v31, 1  ;;  %v494_v42 = vrot.slane %v493_v38, 1  ;;  %v505_v48 = vrot.slane %v504_v45, 1 }
  0x7b   : > { %v473_v30 = vadd.f32 %v472_v27, %v471_v25  ;;  %v484_v36 = vadd.f32 %v483_v15, %v482_v31  ;;  %v495_v44 = vadd.f32 %v494_v42, %v493_v38  ;;  %v506_v49 = vadd.f32 %v505_v48, %v504_v45 }
  0x7d   : > { %v474_v32 = vadd.f32 %v473_v30, %v467_v29  ;;  %v485_v40 = vadd.f32 %v624_v39, %v484_v36  ;;  %v496_v47 = vadd.f32 %v626_v46, %v495_v44  ;;  %v507_v50 = vadd.f32 %v628_v0, %v506_v49 }
  0x7f   : > { %475 = vst [vmem:[%s819_s17] sm:$0x1] %v474_v32  ;;  %625 = vst [vmem:[%s819_s17 + $0x1] sm:$0x1] %v485_v40 }
  0x80   : > { %627 = vst [vmem:[%s819_s17 + $0x2] sm:$0x1] %v496_v47  ;;  %629 = vst [vmem:[%s819_s17 + $0x3] sm:$0x1] %v507_v50 }
  0x81 PF: > { %s12_s13 = sadd.s32 1, %s727_s13   ;;  %s879_s9 = smov %s715_s10 }
  0x82   : > { %p9_p12 = scmp.ge.s32.totalorder %s12_s13, 4   ;;  %s880_s10 = smov %s785_s18 }
  0x83   : > { %s881_s11 = smov %s723_s12  ;;  %s882_s12 = smov %s884_s14 }
  0x84   :  { %11 = sbr.rel (!%p9_p12) target bundleno = 3 (0x3), region = 175 }

</bundles_post_ra>
